<compile_context>
chip_gen: v7x
topology: tpu7x:2x2x1
jax: 0.10.0
libtpu: 0.0.40
codegen_flags: <defaults>
</compile_context>

<pallas_src>
import functools

import jax
import jax.numpy as jnp
from jax.experimental import pallas as pl
from jax.experimental.pallas import tpu as pltpu


def _cdiv(a, b):
    return -(-a // b)


def _conv_bn_relu_kernel(w_ref, shift_ref, x_ref, o_ref):
    # w_ref:     (Cout, Cin)      1x1 conv weight with BN scale folded in (compute dtype)
    # shift_ref: (Cout, 1)        folded BN shift = beta - mean * gamma/sqrt(var+eps), f32
    # x_ref:     (bN, Cin, T)     bN batch elements, T spatial pixels
    # o_ref:     (bN, Cout, T)
    w = w_ref[...]
    shift = shift_ref[...]
    # Static unroll over the (small) batch block; each iteration is one lane-dense matmul.
    for b in range(o_ref.shape[0]):
        acc = jnp.dot(w, x_ref[b], preferred_element_type=jnp.float32)  # (Cout, T) f32
        o_ref[b] = jnp.maximum(acc + shift, 0.0).astype(o_ref.dtype)


@functools.lru_cache(maxsize=None)
def _vmem_cap_bytes():
    """Per-chip usable VMEM cap (75% of physical), with a conservative fallback."""
    try:
        cap = int(pltpu.get_tpu_info().vmem_capacity_bytes)
    except Exception:
        cap = 64 << 20  # conservative: v7x per-TensorCore VMEM
    return max(16 << 20, int(cap * 0.75))


def _plan_blocks(N, Cin, Cout, HW, x_item, o_item, w_item):
    """Pick (tile_hw, num_tiles, bN, n_batch_blocks, vmem_limit) from the VMEM budget."""
    cap = _vmem_cap_bytes()
    headroom = 2 << 20
    # Weight + shift footprint (assume default double-buffering to be safe).
    weight_bytes = 2 * (Cout * Cin * w_item + Cout * 4)
    budget = max(1 << 20, cap - weight_bytes - headroom)
    # Target for the double-buffered x + out tile traffic per grid step.
    target = min(16 << 20, budget)

    per_pixel = 2 * (Cin * x_item + Cout * o_item)  # x + out, double-buffered

    # Spatial tile: full extent if it fits the budget (or is too small to split
    # into 128-lane tiles), otherwise the largest multiple of 128 within budget.
    if HW * per_pixel <= target or HW < 256:
        tile_hw = HW
    else:
        tile_hw = max(128, (target // per_pixel // 128) * 128)
    num_tiles = _cdiv(HW, tile_hw)

    # Batch blocking: if one tile covers the whole feature map and it is small,
    # process several batch elements per grid step to amortize per-step overhead.
    bN = 1
    if num_tiles == 1 and N > 1:
        per_batch = HW * per_pixel
        bN = int(min(N, max(1, target // max(per_batch, 1)), 8))
        while N % bN:  # keep batch blocks exact (no ragged batch block)
            bN -= 1
    n_blocks = N // bN

    # Guarantee >= 2 grid steps when possible so both v7x TensorCores get work
    # (harmless on single-TC v5e/v6e: one extra ~0.35 us step at most).
    if n_blocks * num_tiles < 2:
        if bN > 1:
            bN = max(1, bN // 2)
            while N % bN:
                bN -= 1
            n_blocks = N // bN
        elif HW >= 256:
            tile_hw = max(128, ((HW // 2) // 128) * 128)
            num_tiles = _cdiv(HW, tile_hw)

    tile_bytes = 2 * bN * tile_hw * (Cin * x_item + Cout * o_item)
    vmem_limit = int(min(max(tile_bytes + weight_bytes + headroom, 16 << 20), cap))
    return tile_hw, num_tiles, bN, n_blocks, vmem_limit


@functools.partial(jax.jit, static_argnames=("eps", "compute_dtype", "out_dtype"))
def conv_module_forward(x_nchw, conv_w, bn_gamma, bn_beta, bn_mean, bn_var,
                        eps=1e-5, compute_dtype=jnp.bfloat16, out_dtype=None):
    """Forward of Conv(chi, cho): 1x1 conv (no bias) + BatchNorm2d (eval) + ReLU.

    x_nchw: (N, Cin, H, W)
    conv_w: (Cout, Cin, 1, 1)
    bn_*:   (Cout,)
    returns (N, Cout, H, W) in `out_dtype` (defaults to x dtype).
    """
    N, Cin, H, W = x_nchw.shape
    Cout = conv_w.shape[0]
    HW = H * W
    out_dtype = x_nchw.dtype if out_dtype is None else out_dtype

    # Fold BatchNorm (inference) into the conv weight + a per-channel shift (in f32).
    scale = (bn_gamma.astype(jnp.float32)
             / jnp.sqrt(bn_var.astype(jnp.float32) + eps))                   # (Cout,)
    shift = (bn_beta.astype(jnp.float32)
             - bn_mean.astype(jnp.float32) * scale).reshape(Cout, 1)         # (Cout, 1) f32
    w_folded = (conv_w.reshape(Cout, Cin).astype(jnp.float32)
                * scale.reshape(Cout, 1)).astype(compute_dtype)              # (Cout, Cin)

    # NCHW -> (N, Cin, HW): pure reshape of a contiguous array.  The cast to the
    # compute dtype halves HBM read traffic for the (memory-bound) kernel; in a
    # real bf16 model the producer already emits bf16 so the cast is free.
    x3 = x_nchw.reshape(N, Cin, HW).astype(compute_dtype)

    x_item = jnp.dtype(compute_dtype).itemsize
    o_item = jnp.dtype(out_dtype).itemsize
    tile_hw, num_tiles, bN, n_blocks, vmem_limit = _plan_blocks(
        N, Cin, Cout, HW, x_item, o_item, x_item)

    # NOTE: the ragged last spatial block reads past HW (uninitialized lanes)
    # before the masked store; safe because nothing there feeds a reduction.
    out3 = pl.pallas_call(
        _conv_bn_relu_kernel,
        out_shape=jax.ShapeDtypeStruct((N, Cout, HW), out_dtype),
        grid_spec=pltpu.PrefetchScalarGridSpec(
            num_scalar_prefetch=0,
            grid=(n_blocks, num_tiles),
            in_specs=[
                pl.BlockSpec((Cout, Cin), lambda n, j: (0, 0)),          # folded weight
                pl.BlockSpec((Cout, 1), lambda n, j: (0, 0)),            # BN shift
                pl.BlockSpec((bN, Cin, tile_hw), lambda n, j: (n, 0, j)),  # x tile
            ],
            out_specs=pl.BlockSpec((bN, Cout, tile_hw), lambda n, j: (n, 0, j)),
        ),
        compiler_params=pltpu.CompilerParams(
            dimension_semantics=("parallel", "parallel"),
            vmem_limit_bytes=vmem_limit),
    )(w_folded, shift, x3)

    return out3.reshape(N, Cout, H, W)


def _reference_forward(x_nchw, conv_w, bn_gamma, bn_beta, bn_mean, bn_var, eps=1e-5):
    # Pure-JAX reference (same semantics as the PyTorch module in eval mode).
    Cout = conv_w.shape[0]
    Cin = conv_w.shape[1]
    w_mat = conv_w.reshape(Cout, Cin)
    y = jnp.einsum("nchw,oc->nohw", x_nchw, w_mat)
    scale = (bn_gamma / jnp.sqrt(bn_var + eps)).reshape(1, Cout, 1, 1)
    shift = (bn_beta - bn_mean * bn_gamma / jnp.sqrt(bn_var + eps)).reshape(1, Cout, 1, 1)
    return jnp.maximum(y * scale + shift, 0.0)


if __name__ == "__main__":
    key = jax.random.PRNGKey(0)
    k_x, k_w, k_g, k_b, k_m, k_v = jax.random.split(key, 6)

    N, Cin, H, W = 2, 4, 16, 16
    Cout = 8

    x = jax.random.normal(k_x, (N, Cin, H, W), dtype=jnp.float32)
    conv_w = jax.random.normal(k_w, (Cout, Cin, 1, 1), dtype=jnp.float32) * 0.1
    bn_gamma = 1.0 + 0.1 * jax.random.normal(k_g, (Cout,), dtype=jnp.float32)
    bn_beta = 0.1 * jax.random.normal(k_b, (Cout,), dtype=jnp.float32)
    bn_mean = 0.05 * jax.random.normal(k_m, (Cout,), dtype=jnp.float32)
    bn_var = 1.0 + 0.1 * jax.random.uniform(k_v, (Cout,), dtype=jnp.float32)

    ref = _reference_forward(x, conv_w, bn_gamma, bn_beta, bn_mean, bn_var)

    # Default (perf) path: bf16 activations/weight, f32 accumulation, f32 output.
    out_bf16 = conv_module_forward(x, conv_w, bn_gamma, bn_beta, bn_mean, bn_var)
    out_bf16 = jax.block_until_ready(out_bf16)
    assert out_bf16.shape == (N, Cout, H, W)
    assert out_bf16.dtype == x.dtype
    assert jnp.allclose(out_bf16, ref, atol=3e-2, rtol=5e-2)

    # Exact-ish f32 compute path for tight numerical validation.
    out_f32 = conv_module_forward(x, conv_w, bn_gamma, bn_beta, bn_mean, bn_var,
                                  compute_dtype=jnp.float32)
    out_f32 = jax.block_until_ready(out_f32)
    assert out_f32.shape == (N, Cout, H, W)
    assert jnp.allclose(out_f32, ref, atol=1e-4, rtol=1e-4)

    print("KERNEL_OK")
</pallas_src>

<mosaic_0001>
module attributes {stable_mosaic.version = 11 : i64} {
  func.func @_conv_bn_relu_kernel(%arg0: i32, %arg1: i32, %arg2: memref<8x4xbf16, #tpu.memory_space<vmem>>, %arg3: memref<8x1xf32, #tpu.memory_space<vmem>>, %arg4: memref<1x4x256xbf16, #tpu.memory_space<vmem>>, %arg5: memref<1x8x256xf32, #tpu.memory_space<vmem>>) attributes {dimension_semantics = [#tpu.dimension_semantics<parallel>, #tpu.dimension_semantics<parallel>], iteration_bounds = array<i64: 2, 1>, scalar_prefetch = 0 : i64, scratch_operands = 0 : i64, tpu.core_type = #tpu.core_type<tc>, window_params = [{pipeline_mode = #tpu.pipeline_mode<synchronous>, transform_indices = @transform_0, window_bounds = array<i64: 8, 4>}, {pipeline_mode = #tpu.pipeline_mode<synchronous>, transform_indices = @transform_1, window_bounds = array<i64: 8, 1>}, {transform_indices = @transform_2, window_bounds = array<i64: 1, 4, 256>}, {transform_indices = @transform_3, window_bounds = array<i64: 1, 8, 256>}]} {
    %c0 = arith.constant 0 : index
    %c0_0 = arith.constant 0 : index
    %0 = vector.load %arg2[%c0, %c0_0] : memref<8x4xbf16, #tpu.memory_space<vmem>>, vector<8x4xbf16>
    %c0_1 = arith.constant 0 : index
    %c0_2 = arith.constant 0 : index
    %1 = vector.load %arg3[%c0_1, %c0_2] : memref<8x1xf32, #tpu.memory_space<vmem>>, vector<8x1xf32>
    %c0_3 = arith.constant 0 : index
    %c0_4 = arith.constant 0 : index
    %c0_5 = arith.constant 0 : index
    %2 = vector.load %arg4[%c0_3, %c0_4, %c0_5] : memref<1x4x256xbf16, #tpu.memory_space<vmem>>, vector<1x4x256xbf16>
    %3 = vector.shape_cast %2 : vector<1x4x256xbf16> to vector<4x256xbf16>
    %cst = arith.constant dense<0.000000e+00> : vector<8x256xf32>
    %4 = tpu.matmul %0, %3, %cst {dimension_numbers = #tpu.dot_dimension_numbers<[1], [0], [0], [1], [0, 0, 1, 1], [], []>} : vector<8x4xbf16>, vector<4x256xbf16>, vector<8x256xf32> -> vector<8x256xf32>
    %5 = vector.broadcast %1 : vector<8x1xf32> to vector<8x256xf32>
    %6 = arith.addf %4, %5 : vector<8x256xf32>
    %cst_6 = arith.constant 0.000000e+00 : f32
    %7 = vector.broadcast %cst_6 : f32 to vector<8x256xf32>
    %8 = arith.maximumf %6, %7 : vector<8x256xf32>
    %c0_7 = arith.constant 0 : index
    %c0_8 = arith.constant 0 : index
    %c0_9 = arith.constant 0 : index
    %9 = vector.load %arg5[%c0_7, %c0_8, %c0_9] : memref<1x8x256xf32, #tpu.memory_space<vmem>>, vector<1x8x256xf32>
    %10 = vector.shape_cast %9 : vector<1x8x256xf32> to vector<8x256xf32>
    %11 = vector.shape_cast %8 : vector<8x256xf32> to vector<1x8x256xf32>
    tpu.vector_store %arg5[%c0_7, %c0_8, %c0_9], %11 {strides = array<i32>} : memref<1x8x256xf32, #tpu.memory_space<vmem>>, vector<1x8x256xf32>,
    return
  }
  func.func @transform_0(%arg0: i32, %arg1: i32) -> (i32, i32) {
    %c0_i32 = arith.constant 0 : i32
    %c0_i32_0 = arith.constant 0 : i32
    %c0_i32_1 = arith.constant 0 : i32
    return %c0_i32, %c0_i32_0 : i32, i32
  }
  func.func @transform_1(%arg0: i32, %arg1: i32) -> (i32, i32) {
    %c0_i32 = arith.constant 0 : i32
    %c0_i32_0 = arith.constant 0 : i32
    %c0_i32_1 = arith.constant 0 : i32
    return %c0_i32, %c0_i32_0 : i32, i32
  }
  func.func @transform_2(%arg0: i32, %arg1: i32) -> (i32, i32, i32) {
    %c0_i32 = arith.constant 0 : i32
    %c0_i32_0 = arith.constant 0 : i32
    return %arg0, %c0_i32, %arg1 : i32, i32, i32
  }
  func.func @transform_3(%arg0: i32, %arg1: i32) -> (i32, i32, i32) {
    %c0_i32 = arith.constant 0 : i32
    %c0_i32_0 = arith.constant 0 : i32
    return %arg0, %c0_i32, %arg1 : i32, i32, i32
  }
}

</mosaic_0001>

<bundles_post_ra>
// kernel: conv_module_forward.1
= control target key start
LH: loop header
LB: loop body
LE: loop exit
PB: predicated region body
PF: predicated region fallthrough
CT: control target
= control target key end

     0   :  { %s458_s12 = smov 0   ;;  %s460_s13 = smov 0   ;;  %s497_s0 = inlined_call_operand.vmem [shape: bf16[8,4], index: 0, kind: input, shape index: {}]   ;;  %s498_s1 = inlined_call_operand.vmem [shape: f32[8,1], index: 1, kind: input, shape index: {}]   ;;  %s499_s2 = inlined_call_operand.vmem [shape: bf16[2,4,256], index: 2, kind: input, shape index: {}]   ;;  %s500_s3 = inlined_call_operand.vmem [shape: f32[2,8,256], index: 3, kind: output, shape index: {}]  }
   0x1   :  { %s462_s14 = smov 0  }
   0x2 LB: > { %s25_s15 = sadd.s32 1, %s431_s13  ;;  %p375_p0 = scmp.ge.s32.totalorder %s435_s14, 1  ;;  %s435_s14 = sphi %s462_s14, %s13_s14   ;;  %s431_s13 = sphi %s460_s13, %s502_s13   ;;  %s427_s12 = sphi %s458_s12, %s501_s12  }
   0x3   : > { %p27_p1 = scmp.ge.s32.totalorder %s25_s15, 2  ;;  %p158_p2 = scmp.lt.s32.totalorder %s435_s14, 3 }
   0x5   : > { %s504_s15 = smov (%p27_p1, %s25_s15), 0  ;;  %p159_p3 = pnand %p375_p0, %p158_p2 }
   0x6   : > { %p191_p4 = scmp.lt.s32.totalorder (!%p159_p3), %s427_s12, 1  ;;  %v437_v0 = vmov (!%p159_p3), 0   ;;  %v212_v1 = vld [vmem:[%s498_s1] sm:$0xff] (!%p159_p3)  ;;  %vm232_vm0 = vcmask (!%p159_p3), 1041408   ;;  %vm228_vm1 = vcmask (!%p159_p3), 31744  }
   0x7   : > { %162 = sbr.rel (%p159_p3) target bundleno = 242 (0xf2), region = 32  ;;  %271 = vmatprep.mubr.bf16.mxu0 (!%p159_p3), %v437_v0  ;;  %412 = vset.pattern.permute.xlu0 (!%p159_p3), %v437_v0  ;;  %v211_v5 = vld [vmem:[%s497_s0] sm:$0xf] (!%p159_p3) }
   0x8   : > { %216 = vperm.xlu0 (!%p159_p3), %412, %v212_v1  }
   0xe   : > { %s506_s12 = smov (!%p191_p4, %s427_s12), 1 }
   0xf   : > { %s385_s18 = sshll.u32 %s506_s12, 2  ;;  %s386_s24 = sshll.u32 %s506_s12, 4 }
  0x10   : > { %s198_s21 = scalar_lea.vmem %s499_s2, %s385_s18  ;;  %s208_s27 = scalar_lea.vmem %s500_s3, %s386_s24 }
  0x11   : > { %v380_v2 = vld.sshfl [vmem:[%s198_s21] sm:$0x33 pattern:$0x76325410] }
  0x12   : > { %v227_v3 = vcombine.high %v380_v2, %v380_v2  ;;  %v234_v4 = vsel %vm232_vm0, %v380_v2, 0 }
  0x14   : > { %381 = vmatprep.subr.msk.bf16.mxu0 %vm232_vm0, %v227_v3 }
  0x15   : > { %240 = vmatpush1.bf16.msra.mxu0 %v234_v4 }
  0x18   : > { %382 = vmatmul.mubr.msk.bf16.vlgmr.msra.gmra.mrb[0].mxu0 %vm228_vm1, %v211_v5 }
  0x87   : > { %v217_v6 = vpop.permute.xlu0 %216 }
  0xeb   : > { %v273_v7 = vpop.f32.mrb[0].mxu0 }
  0xec   : > { %v274_v8 = vadd.f32 %v273_v7, %v217_v6  ;;  %v275_v9 = vpop.f32.mrb[1].mxu0 }
  0xed   : > { %v276_v10 = vadd.f32 %v275_v9, %v217_v6  ;;  %v277_v11 = vpop.f32.mrb[2].mxu0 }
  0xee   : > { %v280_v12 = vmax.f32 %v274_v8, 0.0  ;;  %v278_v13 = vpop.f32.mrb[3].mxu0 }
  0xef   : > { %v281_v14 = vmax.f32 %v276_v10, 0.0 }
  0xf0   : > { %282 = vst [vmem:[%s208_s27] sm:$0xff] %v280_v12 }
  0xf1   : > { %283 = vst [vmem:[%s208_s27 + $0x8] sm:$0xff] %v281_v14 }
  0xf2 PF: > { %s13_s14 = sadd.s32 1, %s435_s14   ;;  %s501_s12 = smov %s431_s13 }
  0xf3   : > { %p10_p5 = scmp.ge.s32.totalorder %s13_s14, 4   ;;  %s502_s13 = smov %s504_s15 }
  0xf5   :  { %12 = sbr.rel (!%p10_p5) target bundleno = 2 (0x2), region = 62 }

</bundles_post_ra>
